<compile_context>
chip_gen: v5e
topology: v5e:2x2
jax: 0.10.0
libtpu: 0.0.40
codegen_flags: <defaults>
</compile_context>

<pallas_src>
import functools

import jax
import jax.numpy as jnp
from jax.experimental import pallas as pl
from jax.experimental.pallas import tpu as pltpu


_LOG_EPS = 1e-12  # clamp for log(); torch reference gives -inf/NaN at exact zeros.


def _round_up(a, b):
    return (a + b - 1) // b * b


def _cdiv(a, b):
    return -(-a // b)


def _hann_window(win_length, dtype=jnp.float32):
    # torch.hann_window default (periodic=True): 0.5 - 0.5*cos(2*pi*n/N)
    n = jnp.arange(win_length, dtype=dtype)
    return 0.5 - 0.5 * jnp.cos(2.0 * jnp.pi * n / win_length)


def _dct2_basis(fft_size, win_length, dtype=jnp.float32):
    # Orthonormal DCT-II basis of size fft_size, truncated to the first
    # win_length input samples (the rest of the zero-padded frame is zero).
    n = jnp.arange(fft_size, dtype=dtype)
    k = jnp.arange(fft_size, dtype=dtype)
    basis = jnp.cos(jnp.pi * (n[:, None] + 0.5) * k[None, :] / fft_size)
    scale = jnp.where(k == 0,
                      jnp.sqrt(1.0 / fft_size),
                      jnp.sqrt(2.0 / fft_size))
    return (basis * scale[None, :])[:win_length, :].astype(dtype)  # (L, K)


# ----------------------------- Pallas kernel ------------------------------ #
def _stdct_loss_kernel(xc_ref, xt_ref, yc_ref, yt_ref, w_ref, out_ref,
                       cbx_ref, cby_ref, *, tm, tail, n_sub, cw, n_frames,
                       needs_mask):
    """One (batch, frame-tile) grid step.

    xc_ref / yc_ref : (1, tm, cw)     chunk rows [t*tm, t*tm+tm) of this batch
    xt_ref / yt_ref : (1, tail, cw)   chunk rows [(t+1)*tm, (t+1)*tm+tail)
                                      (aliased view of the same chunk array)
    w_ref           : (n_sub*cw, Kp)  windowed, lane-padded ortho DCT-II basis
    out_ref         : (1, 1, 3, Kp)   lane partial sums for this tile:
                         row 0: sum_f (y_mag - x_mag)^2
                         row 1: sum_f  y_mag^2
                         row 2: sum_f |log(y_mag) - log(x_mag)|
    cbx_ref/cby_ref : (tm+tail, cw)   f32 scratch: contiguous chunk slab
    """
    t = pl.program_id(1)

    # Assemble the contiguous chunk slab for this frame tile (frame f of the
    # tile uses slab rows [f, f+n_sub)).  Cast bf16 streams to f32 here.
    cbx_ref[0:tm, :] = xc_ref[0].astype(jnp.float32)
    cbx_ref[tm:tm + tail, :] = xt_ref[0].astype(jnp.float32)
    cby_ref[0:tm, :] = yc_ref[0].astype(jnp.float32)
    cby_ref[tm:tm + tail, :] = yt_ref[0].astype(jnp.float32)

    def stdct_mag(cb_ref):
        # coef[f] = sum_j chunks[f+j] @ W_j  (window already folded into W).
        coef = jnp.dot(cb_ref[0:tm, :], w_ref[0:cw, :],
                       preferred_element_type=jnp.float32)
        for j in range(1, n_sub):
            coef = coef + jnp.dot(cb_ref[j:j + tm, :],
                                  w_ref[j * cw:(j + 1) * cw, :],
                                  preferred_element_type=jnp.float32)
        return jnp.abs(coef)                                        # (tm, Kp)

    x_mag = stdct_mag(cbx_ref)
    y_mag = stdct_mag(cby_ref)

    if needs_mask:
        # Frames beyond the real frame count reuse real chunks, so they must
        # be masked (zero mags -> 0 contribution; log term is 0 after clamp).
        row = jax.lax.broadcasted_iota(jnp.int32, (tm, 1), 0) + t * tm
        valid = (row < n_frames).astype(jnp.float32)
        x_mag = x_mag * valid
        y_mag = y_mag * valid

    d = y_mag - x_mag
    # One log + one exact divide instead of two logs (halves EUP pressure).
    log_d = jnp.abs(jnp.log(jnp.maximum(y_mag, _LOG_EPS)
                            / jnp.maximum(x_mag, _LOG_EPS)))

    # Sublane reductions only; lanes stay dense.  Direct row writes (no
    # concatenate temp).  Final cross-lane/cross-tile reduce is in plain JAX.
    out_ref[0, 0, 0:1, :] = jnp.sum(d * d, axis=0, keepdims=True)
    out_ref[0, 0, 1:2, :] = jnp.sum(y_mag * y_mag, axis=0, keepdims=True)
    out_ref[0, 0, 2:3, :] = jnp.sum(log_d, axis=0, keepdims=True)


# ------------------------------- glue (JAX) -------------------------------- #
@functools.partial(jax.jit, static_argnames=("fft_size", "shift_size",
                                             "win_length", "tm",
                                             "compute_dtype"))
def stdct_loss(x, y, *, fft_size=64, shift_size=16, win_length=48, tm=1024,
               compute_dtype=jnp.bfloat16):
    """Returns (sc_loss, mag_loss) for signals x, y of shape (B, T).

    compute_dtype controls only the HBM dtype of the chunk streams (default
    bfloat16; all in-kernel math is float32).  Pass jnp.float32 for
    reference-exact results.
    """
    x = x.astype(jnp.float32)
    y = y.astype(jnp.float32)
    B, T = x.shape

    if T < win_length:
        raise ValueError(f"signal length {T} < win_length {win_length}")
    if fft_size < win_length:
        raise ValueError("fft_size must be >= win_length")
    if win_length % shift_size != 0:
        raise NotImplementedError(
            "in-kernel framing requires win_length % shift_size == 0")

    cw = shift_size                    # chunk width
    n_sub = win_length // shift_size   # chunks per frame
    F = (T - win_length) // shift_size + 1   # frames per batch element

    # Hann window folded into the truncated DCT basis, zero-padded to a
    # lane-dense column count (padded lanes contribute exactly 0).
    Kp = _round_up(fft_size, 128)
    window = _hann_window(win_length)                              # (L,)
    dct = _dct2_basis(fft_size, win_length)                        # (L, K)
    dct_w = jnp.pad(window[:, None] * dct,
                    ((0, 0), (0, Kp - fft_size))).astype(jnp.float32)  # (L, Kp)

    # --- balanced frame tiling (multiples of `tail`, which is >=16) ------- #
    tail = _round_up(max(n_sub - 1, 1), 16)       # extra chunk rows per tile
    F_a = _round_up(F, tail)
    num_tiles = max(1, _cdiv(F_a, max(tm, tail)))
    # v7x: keep the parallel grid length even so both TensorCores get work.
    if B % 2 == 1 and num_tiles % 2 == 1 and F_a >= 2 * tail:
        num_tiles += 1
    tm_eff = _round_up(_cdiv(F_a, num_tiles), tail)
    F_pad = num_tiles * tm_eff
    needs_mask = F_pad > F

    # --- chunk view of the signals (no gather, no frame materialization) -- #
    n_chunks = F + n_sub - 1
    used = n_chunks * cw
    C_rows = F_pad + tail

    def to_chunks(sig):
        c = sig[:, :used].reshape(B, n_chunks, cw)
        c = jnp.pad(c, ((0, 0), (0, C_rows - n_chunks), (0, 0)))
        return c.astype(compute_dtype)

    xc = to_chunks(x)
    yc = to_chunks(y)

    blk_ratio = tm_eff // tail

    kernel = functools.partial(
        _stdct_loss_kernel, tm=tm_eff, tail=tail, n_sub=n_sub, cw=cw,
        n_frames=F, needs_mask=needs_mask)

    partials = pl.pallas_call(
        kernel,
        grid=(B, num_tiles),
        in_specs=[
            # main chunk block of this frame tile
            pl.BlockSpec((1, tm_eff, cw), lambda b, t: (b, t, 0)),
            # aliased tail block: the next `tail` chunk rows of the same array
            pl.BlockSpec((1, tail, cw),
                         lambda b, t: (b, (t + 1) * blk_ratio, 0)),
            pl.BlockSpec((1, tm_eff, cw), lambda b, t: (b, t, 0)),
            pl.BlockSpec((1, tail, cw),
                         lambda b, t: (b, (t + 1) * blk_ratio, 0)),
            # windowed DCT basis (resident; block index never changes)
            pl.BlockSpec((win_length, Kp), lambda b, t: (0, 0)),
        ],
        out_specs=pl.BlockSpec((1, 1, 3, Kp), lambda b, t: (b, t, 0, 0)),
        out_shape=jax.ShapeDtypeStruct((B, num_tiles, 3, Kp), jnp.float32),
        scratch_shapes=[
            pltpu.VMEM((tm_eff + tail, cw), jnp.float32),
            pltpu.VMEM((tm_eff + tail, cw), jnp.float32),
        ],
        compiler_params=pltpu.CompilerParams(
            dimension_semantics=("parallel", "parallel")),
    )(xc, xc, yc, yc, dct_w)

    totals = jnp.sum(partials, axis=(0, 1, 3))                     # (3,)
    sc_loss = jnp.sqrt(totals[0]) / jnp.sqrt(totals[1])
    mag_loss = totals[2] / jnp.float32(B * F * fft_size)
    return sc_loss, mag_loss


# --------------------------- pure-JAX reference ---------------------------- #
def _frame_ref(signal, win_length, shift_size):
    B, T = signal.shape
    n_frames = (T - win_length) // shift_size + 1
    idx = (jnp.arange(n_frames)[:, None] * shift_size
           + jnp.arange(win_length)[None, :])
    return signal[:, idx]                                          # (B, F, L)


def _stdct_loss_ref(x, y, *, fft_size=64, shift_size=16, win_length=48):
    window = _hann_window(win_length)
    dct = _dct2_basis(fft_size, win_length)
    xf = _frame_ref(x.astype(jnp.float32), win_length, shift_size)
    yf = _frame_ref(y.astype(jnp.float32), win_length, shift_size)
    x_mag = jnp.abs((xf * window) @ dct)
    y_mag = jnp.abs((yf * window) @ dct)
    sc = jnp.linalg.norm(y_mag - x_mag) / jnp.linalg.norm(y_mag)
    mag = jnp.mean(jnp.abs(jnp.log(jnp.maximum(y_mag, _LOG_EPS))
                           - jnp.log(jnp.maximum(x_mag, _LOG_EPS))))
    return sc, mag


if __name__ == "__main__":
    key = jax.random.PRNGKey(0)
    kx, ky, kx2, ky2, kx3, ky3 = jax.random.split(key, 6)

    cfg = dict(fft_size=64, shift_size=16, win_length=48)

    # Case 1: B=2, T=288 -> 16 frames per batch element (one tile per batch).
    B, T = 2, 288
    x = jax.random.normal(kx, (B, T), dtype=jnp.float32)
    y = jax.random.normal(ky, (B, T), dtype=jnp.float32)
    sc_ref, mag_ref = _stdct_loss_ref(x, y, **cfg)

    # f32 stream path: validated at tight tolerance.
    sc, mag = stdct_loss(x, y, compute_dtype=jnp.float32, **cfg)
    sc, mag = jax.block_until_ready((sc, mag))
    assert jnp.allclose(sc, sc_ref, rtol=2e-4, atol=1e-4), (sc, sc_ref)
    assert jnp.allclose(mag, mag_ref, rtol=2e-4, atol=1e-4), (mag, mag_ref)

    # Default bf16 HBM-stream path: inputs are quantized -> loose tolerance.
    sc_b, mag_b = stdct_loss(x, y, **cfg)
    sc_b, mag_b = jax.block_until_ready((sc_b, mag_b))
    assert jnp.allclose(sc_b, sc_ref, rtol=2e-2, atol=2e-2), (sc_b, sc_ref)
    assert jnp.allclose(mag_b, mag_ref, rtol=2e-2, atol=2e-2), (mag_b, mag_ref)

    # Case 2: odd B, 23 frames/batch (exercises frame mask + even tile count).
    B2, T2 = 3, 400
    x2 = jax.random.normal(kx2, (B2, T2), dtype=jnp.float32)
    y2 = jax.random.normal(ky2, (B2, T2), dtype=jnp.float32)
    sc2_ref, mag2_ref = _stdct_loss_ref(x2, y2, **cfg)
    sc2, mag2 = stdct_loss(x2, y2, compute_dtype=jnp.float32, **cfg)
    sc2, mag2 = jax.block_until_ready((sc2, mag2))
    assert jnp.allclose(sc2, sc2_ref, rtol=2e-4, atol=1e-4), (sc2, sc2_ref)
    assert jnp.allclose(mag2, mag2_ref, rtol=2e-4, atol=1e-4), (mag2, mag2_ref)

    # Case 3: longer signal (1022 frames/batch, full 1024-row tile + mask),
    # default bf16 path.
    B3, T3 = 2, 16384
    x3 = jax.random.normal(kx3, (B3, T3), dtype=jnp.float32)
    y3 = jax.random.normal(ky3, (B3, T3), dtype=jnp.float32)
    sc3_ref, mag3_ref = _stdct_loss_ref(x3, y3, **cfg)
    sc3, mag3 = stdct_loss(x3, y3, **cfg)
    sc3, mag3 = jax.block_until_ready((sc3, mag3))
    assert jnp.allclose(sc3, sc3_ref, rtol=2e-2, atol=2e-2), (sc3, sc3_ref)
    assert jnp.allclose(mag3, mag3_ref, rtol=2e-2, atol=2e-2), (mag3, mag3_ref)

    print("KERNEL_OK")
</pallas_src>

<mosaic_0001>
module attributes {stable_mosaic.version = 11 : i64} {
  func.func @_stdct_loss_kernel(%arg0: i32, %arg1: i32, %arg2: memref<1x16x16xf32, #tpu.memory_space<vmem>>, %arg3: memref<1x16x16xf32, #tpu.memory_space<vmem>>, %arg4: memref<1x16x16xf32, #tpu.memory_space<vmem>>, %arg5: memref<1x16x16xf32, #tpu.memory_space<vmem>>, %arg6: memref<48x128xf32, #tpu.memory_space<vmem>>, %arg7: memref<1x1x3x128xf32, #tpu.memory_space<vmem>>, %arg8: memref<32x16xf32, #tpu.memory_space<vmem>>, %arg9: memref<32x16xf32, #tpu.memory_space<vmem>>) attributes {dimension_semantics = [#tpu.dimension_semantics<parallel>, #tpu.dimension_semantics<parallel>], iteration_bounds = array<i64: 2, 1>, scalar_prefetch = 0 : i64, scratch_operands = 2 : i64, tpu.core_type = #tpu.core_type<tc>, window_params = [{transform_indices = @transform_0, window_bounds = array<i64: 1, 16, 16>}, {transform_indices = @transform_1, window_bounds = array<i64: 1, 16, 16>}, {transform_indices = @transform_2, window_bounds = array<i64: 1, 16, 16>}, {transform_indices = @transform_3, window_bounds = array<i64: 1, 16, 16>}, {pipeline_mode = #tpu.pipeline_mode<synchronous>, transform_indices = @transform_4, window_bounds = array<i64: 48, 128>}, {transform_indices = @transform_5, window_bounds = array<i64: 1, 1, 3, 128>}]} {
    %c0 = arith.constant 0 : index
    %c0_0 = arith.constant 0 : index
    %c0_1 = arith.constant 0 : index
    %0 = vector.load %arg2[%c0, %c0_0, %c0_1] : memref<1x16x16xf32, #tpu.memory_space<vmem>>, vector<1x16x16xf32>
    %1 = vector.shape_cast %0 : vector<1x16x16xf32> to vector<16x16xf32>
    %c0_2 = arith.constant 0 : index
    %c0_3 = arith.constant 0 : index
    %2 = vector.load %arg8[%c0_2, %c0_3] : memref<32x16xf32, #tpu.memory_space<vmem>>, vector<16x16xf32>
    tpu.vector_store %arg8[%c0_2, %c0_3], %1 {strides = array<i32>} : memref<32x16xf32, #tpu.memory_space<vmem>>, vector<16x16xf32>,
    %c0_4 = arith.constant 0 : index
    %c0_5 = arith.constant 0 : index
    %c0_6 = arith.constant 0 : index
    %3 = vector.load %arg3[%c0_4, %c0_5, %c0_6] : memref<1x16x16xf32, #tpu.memory_space<vmem>>, vector<1x16x16xf32>
    %4 = vector.shape_cast %3 : vector<1x16x16xf32> to vector<16x16xf32>
    %c16 = arith.constant 16 : index
    %c0_7 = arith.constant 0 : index
    %5 = vector.load %arg8[%c16, %c0_7] : memref<32x16xf32, #tpu.memory_space<vmem>>, vector<16x16xf32>
    tpu.vector_store %arg8[%c16, %c0_7], %4 {strides = array<i32>} : memref<32x16xf32, #tpu.memory_space<vmem>>, vector<16x16xf32>,
    %c0_8 = arith.constant 0 : index
    %c0_9 = arith.constant 0 : index
    %c0_10 = arith.constant 0 : index
    %6 = vector.load %arg4[%c0_8, %c0_9, %c0_10] : memref<1x16x16xf32, #tpu.memory_space<vmem>>, vector<1x16x16xf32>
    %7 = vector.shape_cast %6 : vector<1x16x16xf32> to vector<16x16xf32>
    %c0_11 = arith.constant 0 : index
    %c0_12 = arith.constant 0 : index
    %8 = vector.load %arg9[%c0_11, %c0_12] : memref<32x16xf32, #tpu.memory_space<vmem>>, vector<16x16xf32>
    tpu.vector_store %arg9[%c0_11, %c0_12], %7 {strides = array<i32>} : memref<32x16xf32, #tpu.memory_space<vmem>>, vector<16x16xf32>,
    %c0_13 = arith.constant 0 : index
    %c0_14 = arith.constant 0 : index
    %c0_15 = arith.constant 0 : index
    %9 = vector.load %arg5[%c0_13, %c0_14, %c0_15] : memref<1x16x16xf32, #tpu.memory_space<vmem>>, vector<1x16x16xf32>
    %10 = vector.shape_cast %9 : vector<1x16x16xf32> to vector<16x16xf32>
    %c16_16 = arith.constant 16 : index
    %c0_17 = arith.constant 0 : index
    %11 = vector.load %arg9[%c16_16, %c0_17] : memref<32x16xf32, #tpu.memory_space<vmem>>, vector<16x16xf32>
    tpu.vector_store %arg9[%c16_16, %c0_17], %10 {strides = array<i32>} : memref<32x16xf32, #tpu.memory_space<vmem>>, vector<16x16xf32>,
    %c0_18 = arith.constant 0 : index
    %c0_19 = arith.constant 0 : index
    %12 = vector.load %arg8[%c0_18, %c0_19] : memref<32x16xf32, #tpu.memory_space<vmem>>, vector<16x16xf32>
    %c0_20 = arith.constant 0 : index
    %c0_21 = arith.constant 0 : index
    %13 = vector.load %arg6[%c0_20, %c0_21] : memref<48x128xf32, #tpu.memory_space<vmem>>, vector<16x128xf32>
    %cst = arith.constant dense<0.000000e+00> : vector<16x128xf32>
    %14 = tpu.matmul %12, %13, %cst {dimension_numbers = #tpu.dot_dimension_numbers<[1], [0], [0], [1], [0, 0, 1, 1], [], []>} : vector<16x16xf32>, vector<16x128xf32>, vector<16x128xf32> -> vector<16x128xf32>
    %c1 = arith.constant 1 : index
    %c0_22 = arith.constant 0 : index
    %15 = vector.load %arg8[%c1, %c0_22] : memref<32x16xf32, #tpu.memory_space<vmem>>, vector<16x16xf32>
    %c16_23 = arith.constant 16 : index
    %c0_24 = arith.constant 0 : index
    %16 = vector.load %arg6[%c16_23, %c0_24] : memref<48x128xf32, #tpu.memory_space<vmem>>, vector<16x128xf32>
    %cst_25 = arith.constant dense<0.000000e+00> : vector<16x128xf32>
    %17 = tpu.matmul %15, %16, %cst_25 {dimension_numbers = #tpu.dot_dimension_numbers<[1], [0], [0], [1], [0, 0, 1, 1], [], []>} : vector<16x16xf32>, vector<16x128xf32>, vector<16x128xf32> -> vector<16x128xf32>
    %18 = arith.addf %14, %17 : vector<16x128xf32>
    %c2 = arith.constant 2 : index
    %c0_26 = arith.constant 0 : index
    %19 = vector.load %arg8[%c2, %c0_26] : memref<32x16xf32, #tpu.memory_space<vmem>>, vector<16x16xf32>
    %c32 = arith.constant 32 : index
    %c0_27 = arith.constant 0 : index
    %20 = vector.load %arg6[%c32, %c0_27] : memref<48x128xf32, #tpu.memory_space<vmem>>, vector<16x128xf32>
    %cst_28 = arith.constant dense<0.000000e+00> : vector<16x128xf32>
    %21 = tpu.matmul %19, %20, %cst_28 {dimension_numbers = #tpu.dot_dimension_numbers<[1], [0], [0], [1], [0, 0, 1, 1], [], []>} : vector<16x16xf32>, vector<16x128xf32>, vector<16x128xf32> -> vector<16x128xf32>
    %22 = arith.addf %18, %21 : vector<16x128xf32>
    %23 = math.absf %22 : vector<16x128xf32>
    %c0_29 = arith.constant 0 : index
    %c0_30 = arith.constant 0 : index
    %24 = vector.load %arg9[%c0_29, %c0_30] : memref<32x16xf32, #tpu.memory_space<vmem>>, vector<16x16xf32>
    %c0_31 = arith.constant 0 : index
    %c0_32 = arith.constant 0 : index
    %25 = vector.load %arg6[%c0_31, %c0_32] : memref<48x128xf32, #tpu.memory_space<vmem>>, vector<16x128xf32>
    %cst_33 = arith.constant dense<0.000000e+00> : vector<16x128xf32>
    %26 = tpu.matmul %24, %25, %cst_33 {dimension_numbers = #tpu.dot_dimension_numbers<[1], [0], [0], [1], [0, 0, 1, 1], [], []>} : vector<16x16xf32>, vector<16x128xf32>, vector<16x128xf32> -> vector<16x128xf32>
    %c1_34 = arith.constant 1 : index
    %c0_35 = arith.constant 0 : index
    %27 = vector.load %arg9[%c1_34, %c0_35] : memref<32x16xf32, #tpu.memory_space<vmem>>, vector<16x16xf32>
    %c16_36 = arith.constant 16 : index
    %c0_37 = arith.constant 0 : index
    %28 = vector.load %arg6[%c16_36, %c0_37] : memref<48x128xf32, #tpu.memory_space<vmem>>, vector<16x128xf32>
    %cst_38 = arith.constant dense<0.000000e+00> : vector<16x128xf32>
    %29 = tpu.matmul %27, %28, %cst_38 {dimension_numbers = #tpu.dot_dimension_numbers<[1], [0], [0], [1], [0, 0, 1, 1], [], []>} : vector<16x16xf32>, vector<16x128xf32>, vector<16x128xf32> -> vector<16x128xf32>
    %30 = arith.addf %26, %29 : vector<16x128xf32>
    %c2_39 = arith.constant 2 : index
    %c0_40 = arith.constant 0 : index
    %31 = vector.load %arg9[%c2_39, %c0_40] : memref<32x16xf32, #tpu.memory_space<vmem>>, vector<16x16xf32>
    %c32_41 = arith.constant 32 : index
    %c0_42 = arith.constant 0 : index
    %32 = vector.load %arg6[%c32_41, %c0_42] : memref<48x128xf32, #tpu.memory_space<vmem>>, vector<16x128xf32>
    %cst_43 = arith.constant dense<0.000000e+00> : vector<16x128xf32>
    %33 = tpu.matmul %31, %32, %cst_43 {dimension_numbers = #tpu.dot_dimension_numbers<[1], [0], [0], [1], [0, 0, 1, 1], [], []>} : vector<16x16xf32>, vector<16x128xf32>, vector<16x128xf32> -> vector<16x128xf32>
    %34 = arith.addf %30, %33 : vector<16x128xf32>
    %35 = math.absf %34 : vector<16x128xf32>
    %36 = arith.subf %35, %23 : vector<16x128xf32>
    %cst_44 = arith.constant 9.99999996E-13 : f32
    %37 = vector.broadcast %cst_44 : f32 to vector<16x128xf32>
    %38 = arith.maximumf %35, %37 : vector<16x128xf32>
    %cst_45 = arith.constant 9.99999996E-13 : f32
    %39 = vector.broadcast %cst_45 : f32 to vector<16x128xf32>
    %40 = arith.maximumf %23, %39 : vector<16x128xf32>
    %41 = arith.divf %38, %40 : vector<16x128xf32>
    %42 = math.log %41 : vector<16x128xf32>
    %43 = math.absf %42 : vector<16x128xf32>
    %44 = arith.mulf %36, %36 : vector<16x128xf32>
    %cst_46 = arith.constant dense<0.000000e+00> : vector<128xf32>
    %45 = vector.multi_reduction <add>, %44, %cst_46 [0] : vector<16x128xf32> to vector<128xf32>
    %46 = vector.shape_cast %45 : vector<128xf32> to vector<1x128xf32>
    %c0_47 = arith.constant 0 : index
    %c0_48 = arith.constant 0 : index
    %c0_49 = arith.constant 0 : index
    %c0_50 = arith.constant 0 : index
    %47 = vector.load %arg7[%c0_47, %c0_48, %c0_49, %c0_50] : memref<1x1x3x128xf32, #tpu.memory_space<vmem>>, vector<1x1x1x128xf32>
    %48 = vector.shape_cast %47 : vector<1x1x1x128xf32> to vector<1x128xf32>
    %49 = vector.shape_cast %46 : vector<1x128xf32> to vector<1x1x1x128xf32>
    tpu.vector_store %arg7[%c0_47, %c0_48, %c0_49, %c0_50], %49 {strides = array<i32>} : memref<1x1x3x128xf32, #tpu.memory_space<vmem>>, vector<1x1x1x128xf32>,
    %50 = arith.mulf %35, %35 : vector<16x128xf32>
    %cst_51 = arith.constant dense<0.000000e+00> : vector<128xf32>
    %51 = vector.multi_reduction <add>, %50, %cst_51 [0] : vector<16x128xf32> to vector<128xf32>
    %52 = vector.shape_cast %51 : vector<128xf32> to vector<1x128xf32>
    %c0_52 = arith.constant 0 : index
    %c0_53 = arith.constant 0 : index
    %c1_54 = arith.constant 1 : index
    %c0_55 = arith.constant 0 : index
    %53 = vector.load %arg7[%c0_52, %c0_53, %c1_54, %c0_55] : memref<1x1x3x128xf32, #tpu.memory_space<vmem>>, vector<1x1x1x128xf32>
    %54 = vector.shape_cast %53 : vector<1x1x1x128xf32> to vector<1x128xf32>
    %55 = vector.shape_cast %52 : vector<1x128xf32> to vector<1x1x1x128xf32>
    tpu.vector_store %arg7[%c0_52, %c0_53, %c1_54, %c0_55], %55 {strides = array<i32>} : memref<1x1x3x128xf32, #tpu.memory_space<vmem>>, vector<1x1x1x128xf32>,
    %cst_56 = arith.constant dense<0.000000e+00> : vector<128xf32>
    %56 = vector.multi_reduction <add>, %43, %cst_56 [0] : vector<16x128xf32> to vector<128xf32>
    %57 = vector.shape_cast %56 : vector<128xf32> to vector<1x128xf32>
    %c0_57 = arith.constant 0 : index
    %c0_58 = arith.constant 0 : index
    %c2_59 = arith.constant 2 : index
    %c0_60 = arith.constant 0 : index
    %58 = vector.load %arg7[%c0_57, %c0_58, %c2_59, %c0_60] : memref<1x1x3x128xf32, #tpu.memory_space<vmem>>, vector<1x1x1x128xf32>
    %59 = vector.shape_cast %58 : vector<1x1x1x128xf32> to vector<1x128xf32>
    %60 = vector.shape_cast %57 : vector<1x128xf32> to vector<1x1x1x128xf32>
    tpu.vector_store %arg7[%c0_57, %c0_58, %c2_59, %c0_60], %60 {strides = array<i32>} : memref<1x1x3x128xf32, #tpu.memory_space<vmem>>, vector<1x1x1x128xf32>,
    return
  }
  func.func @transform_0(%arg0: i32, %arg1: i32) -> (i32, i32, i32) {
    %c0_i32 = arith.constant 0 : i32
    %c0_i32_0 = arith.constant 0 : i32
    return %arg0, %arg1, %c0_i32 : i32, i32, i32
  }
  func.func @transform_1(%arg0: i32, %arg1: i32) -> (i32, i32, i32) {
    %c1_i32 = arith.constant 1 : i32
    %0 = arith.addi %arg1, %c1_i32 : i32
    %c1_i32_0 = arith.constant 1 : i32
    %1 = arith.muli %0, %c1_i32_0 : i32
    %c0_i32 = arith.constant 0 : i32
    %c0_i32_1 = arith.constant 0 : i32
    return %arg0, %1, %c0_i32 : i32, i32, i32
  }
  func.func @transform_2(%arg0: i32, %arg1: i32) -> (i32, i32, i32) {
    %c0_i32 = arith.constant 0 : i32
    %c0_i32_0 = arith.constant 0 : i32
    return %arg0, %arg1, %c0_i32 : i32, i32, i32
  }
  func.func @transform_3(%arg0: i32, %arg1: i32) -> (i32, i32, i32) {
    %c1_i32 = arith.constant 1 : i32
    %0 = arith.addi %arg1, %c1_i32 : i32
    %c1_i32_0 = arith.constant 1 : i32
    %1 = arith.muli %0, %c1_i32_0 : i32
    %c0_i32 = arith.constant 0 : i32
    %c0_i32_1 = arith.constant 0 : i32
    return %arg0, %1, %c0_i32 : i32, i32, i32
  }
  func.func @transform_4(%arg0: i32, %arg1: i32) -> (i32, i32) {
    %c0_i32 = arith.constant 0 : i32
    %c0_i32_0 = arith.constant 0 : i32
    %c0_i32_1 = arith.constant 0 : i32
    return %c0_i32, %c0_i32_0 : i32, i32
  }
  func.func @transform_5(%arg0: i32, %arg1: i32) -> (i32, i32, i32, i32) {
    %c0_i32 = arith.constant 0 : i32
    %c0_i32_0 = arith.constant 0 : i32
    %c0_i32_1 = arith.constant 0 : i32
    return %arg0, %arg1, %c0_i32, %c0_i32_0 : i32, i32, i32, i32
  }
}

</mosaic_0001>

<bundles_post_ra>
// kernel: stdct_loss.1
= control target key start
LH: loop header
LB: loop body
LE: loop exit
PB: predicated region body
PF: predicated region fallthrough
CT: control target
= control target key end

     0   :  { %s925_s18 = smov 0   ;;  %s927_s19 = smov 0   ;;  %s1007_s0 = inlined_call_operand.vmem [shape: f32[2,32,16], index: 0, kind: input, shape index: {}, may-alias: {0,1}]   ;;  %s1008_s1 = inlined_call_operand.vmem [shape: f32[2,32,16], index: 1, kind: input, shape index: {}, may-alias: {0,1}]   ;;  %s1009_s2 = inlined_call_operand.vmem [shape: f32[2,32,16], index: 2, kind: input, shape index: {}, may-alias: {2,3}]   ;;  %s1010_s3 = inlined_call_operand.vmem [shape: f32[2,32,16], index: 3, kind: input, shape index: {}, may-alias: {2,3}]   ;;  %s1011_s4 = inlined_call_operand.vmem [shape: f32[48,128], index: 4, kind: input, shape index: {}]   ;;  %s1012_s5 = inlined_call_operand.vmem [shape: f32[2,1,3,128], index: 5, kind: output, shape index: {}]  }
   0x1   :  { %s929_s20 = smov 0  }
   0x2 LB: > { %s27_s21 = sadd.s32 1, %s889_s19  ;;  %p803_p0 = scmp.ge.s32.totalorder %s893_s20, 1  ;;  %s893_s20 = sphi %s929_s20, %s15_s20   ;;  %s889_s19 = sphi %s927_s19, %s1014_s19   ;;  %s885_s18 = sphi %s925_s18, %s1013_s18  }
   0x3   : > { %p29_p1 = scmp.ge.s32.totalorder %s27_s21, 2  ;;  %p267_p2 = scmp.lt.s32.totalorder %s893_s20, 3 }
   0x5   : > { %s1016_s21 = smov (%p29_p1, %s27_s21), 0  ;;  %p268_p3 = pnand %p803_p0, %p267_p2 }
   0x6   : > { %p331_p4 = scmp.lt.s32.totalorder (!%p268_p3), %s885_s18, 1 }
   0x7   : > { %271 = sbr.rel (%p268_p3) target bundleno = 224 (0xe0), region = 40 }
   0xc   : > { %v401_v0 = vld [vmem:[%s1011_s4 + $0x8] sm:$0xff]  ;;  %v405_v1 = vld [vmem:[%s1011_s4 + $0x18] sm:$0xff]  ;;  %v400_v2 = vld [vmem:[%s1011_s4] sm:$0xff]  ;;  %s1018_s18 = smov (!%p331_p4, %s885_s18), 1  ;;  %vm383_vm0 = vcmask 130048  }
   0xd   : > { %837 = vmatpush.msra.mxu3 %v401_v0  ;;  %835 = vmatpush.msra.mxu2 %v405_v1  ;;  %v404_v3 = vld [vmem:[%s1011_s4 + $0x10] sm:$0xff]  ;;  %v467_v4 = vld [vmem:[%s1011_s4 + $0x28] sm:$0xff]  ;;  %v466_v5 = vld [vmem:[%s1011_s4 + $0x20] sm:$0xff]  ;;  %s827_s9 = sshll.u32 %s1018_s18, 5  ;;  %s812_s27 = sshll.u32 %s1018_s18, 2 }
   0xe   : > { %426 = vmatpush.msra.mxu0 %v405_v1  ;;  %455 = vmatpush.msra.mxu1 %v401_v0  ;;  %s338_s12 = scalar_lea.vmem %s1007_s0, %s827_s9  ;;  %s829_s13 = sadd.s32 16, %s827_s9 }
   0xf   : > { %838 = vmatpush.msra.mxu3 %v400_v2  ;;  %836 = vmatpush.msra.mxu2 %v404_v3  ;;  %v382_v6 = vld [vmem:[%s338_s12 + $0x8] sm:$0xff]  ;;  %s349_s16 = scalar_lea.vmem %s1008_s1, %s829_s13  ;;  %s360_s23 = scalar_lea.vmem %s1009_s2, %s827_s9  ;;  %v381_v8 = vld [vmem:[%s338_s12] sm:$0xff] }
  0x10   : > { %427 = vmatpush.msra.mxu0 %v404_v3  ;;  %456 = vmatpush.msra.mxu1 %v400_v2  ;;  %385 = vst.msk [vmem:[#allocation2 + $0x8] sm:$0xff] %vm383_vm0, %v382_v6  ;;  %v386_v7 = vld [vmem:[%s349_s16] sm:$0xff]  ;;  %s371_s26 = scalar_lea.vmem %s1010_s3, %s829_s13  ;;  %v391_v10 = vld [vmem:[%s360_s23 + $0x8] sm:$0xff]  ;;  %s380_s30 = scalar_lea.vmem %s1012_s5, %s812_s27 }
  0x11   : > { %488 = vmatpush.msrb.mxu2 %v467_v4  ;;  %525 = vmatpush.msrb.mxu3 %v405_v1  ;;  %388 = vst.msk [vmem:[#allocation2 + $0x10] sm:$0xff] %vm383_vm0, %v386_v7  ;;  %v390_v9 = vld [vmem:[%s360_s23] sm:$0xff] }
  0x12   : > { %554 = vmatpush.msrb.mxu0 %v401_v0  ;;  %585 = vmatpush.msrb.mxu1 %v467_v4  ;;  %384 = vst.msk [vmem:[#allocation2] sm:$0xff] %vm383_vm0, %v381_v8  ;;  %v394_v11 = vld [vmem:[%s371_s26] sm:$0xff] }
  0x13   : > { %489 = vmatpush.msrb.mxu2 %v466_v5  ;;  %526 = vmatpush.msrb.mxu3 %v404_v3  ;;  %392 = vst.msk [vmem:[#allocation3] sm:$0xff] %vm383_vm0, %v390_v9 }
  0x14   : > { %555 = vmatpush.msrb.mxu0 %v400_v2  ;;  %586 = vmatpush.msrb.mxu1 %v466_v5  ;;  %393 = vst.msk [vmem:[#allocation3 + $0x8] sm:$0xff] %vm383_vm0, %v391_v10 }
  0x15   : > { %396 = vst.msk [vmem:[#allocation3 + $0x10] sm:$0xff] %vm383_vm0, %v394_v11 }
  0x17   : > { %v399_v12 = vld [vmem:[#allocation2 + $0x8] sm:$0xff] }
  0x18   : > { %816 = vmatmul.msk.f32.vlgmr.msra.gmra.mxu3 %vm383_vm0, %v399_v12  ;;  %v403_v13 = vld [vmem:[#allocation2 + $0x9] sm:$0xff] }
  0x19   : > { %814 = vmatmul.msk.f32.vlgmr.msra.gmra.mxu2 %vm383_vm0, %v403_v13  ;;  %v402_v14 = vld [vmem:[#allocation2 + $0x1] sm:$0xff]  ;;  %v465_v21 = vld [vmem:[#allocation2 + $0xa] sm:$0xff] }
  0x1a   : > { %v398_v15 = vld [vmem:[#allocation2] sm:$0xff]  ;;  %813 = vmatmul.msk.f32.vlgmr.msra.gmra.mxu0 %vm383_vm0, %v402_v14 }
  0x1b   : > { %815 = vmatmul.msk.f32.vlgmr.msra.gmra.mxu1 %vm383_vm0, %v398_v15  ;;  %v503_v16 = vld [vmem:[#allocation3 + $0x1] sm:$0xff] }
  0x1c   : > { %v464_v17 = vld [vmem:[#allocation2 + $0x2] sm:$0xff]  ;;  %v564_v23 = vld [vmem:[#allocation3 + $0xa] sm:$0xff] }
  0x1d   : > { %v501_v18 = vld [vmem:[#allocation3] sm:$0xff]  ;;  %v504_v20 = vld [vmem:[#allocation3 + $0x9] sm:$0xff] }
  0x1e   : > { %v563_v19 = vld [vmem:[#allocation3 + $0x2] sm:$0xff] }
  0x1f   : > { %v502_v22 = vld [vmem:[#allocation3 + $0x8] sm:$0xff] }
  0x20   : > { %819 = vmatmul.msk.f32.vlgmr.msrb.gmra.mxu3 %vm383_vm0, %v503_v16 }
  0x21   : > { %817 = vmatmul.msk.f32.vlgmr.msrb.gmra.mxu2 %vm383_vm0, %v464_v17 }
  0x22   : > { %821 = vmatmul.msk.f32.vlgmr.msrb.gmra.mxu0 %vm383_vm0, %v501_v18 }
  0x23   : > { %823 = vmatmul.msk.f32.vlgmr.msrb.gmra.mxu1 %vm383_vm0, %v563_v19 }
  0x28   : > { %820 = vmatmul.msk.f32.gmra.mxu3 %vm383_vm0, %v504_v20 }
  0x29   : > { %818 = vmatmul.msk.f32.gmra.mxu2 %vm383_vm0, %v465_v21 }
  0x2a   : > { %822 = vmatmul.msk.f32.gmra.mxu0 %vm383_vm0, %v502_v22 }
  0x2b   : > { %824 = vmatmul.msk.f32.gmra.mxu1 %vm383_vm0, %v564_v23 }
  0x97   : > { %v429_v24 = vpop.f32.mrf.mxu0 }
  0x98   : > { %v458_v25 = vpop.f32.mrf.mxu1 }
  0x99   : > { %v459_v29 = vadd.f32 %v458_v25, %v429_v24 }
  0x9b   : > { %v461_v26 = vpop.f32.mrf.mxu3 }
  0x9c   : > { %v432_v27 = vpop.f32.mrf.mxu2 }
  0x9d   : > { %v462_v39 = vadd.f32 %v461_v26, %v432_v27 }
  0x9f   : > { %v557_v28 = vpop.f32.mrf.mxu0 }
  0xa0   : > { %v588_v30 = vpop.f32.mrf.mxu1 }
  0xa3   : > { %v528_v31 = vpop.f32.mrf.mxu3 }
  0xa4   : > { %v558_v32 = vadd.f32 %v557_v28, %v528_v31  ;;  %v491_v33 = vpop.f32.mrf.mxu2 }
  0xa5   : > { %v497_v34 = vadd.f32 %v491_v33, %v459_v29 }
  0xa6   : > { %v594_v36 = vadd.f32 %v588_v30, %v558_v32 }
  0xa7   : > { %v499_v35 = vand.u32 2147483647, %v497_v34  ;;  %v560_v38 = vpop.f32.mrf.mxu0 }
  0xa8   : > { %v591_v41 = vpop.f32.mrf.mxu1  ;;  %v596_v42 = vand.u32 2147483647, %v594_v36 }
  0xa9   : > { %v602_v37 = vmax.f32 %v499_v35, 1e-12 }
  0xaa   : > { %v598_v48 = vsub.f32 %v596_v42, %v499_v35  ;;  %v650_v53 = vmul.f32 %v596_v42, %v596_v42  ;;  %v600_v4 = vmax.f32 %v596_v42, 1e-12 }
  0xab   : > { %863 = vrcp.f32 %v602_v37  ;;  %v531_v40 = vpop.f32.mrf.mxu3  ;;  %v613_v59 = vand.u32 2147483647, %v602_v37  ;;  %v615_v60 = vand.u32 2147483648, %v602_v37  ;;  %vm609_vm2 = vweird.f32 %v602_v37 }
  0xac   : > { %v561_v43 = vadd.f32 %v560_v38, %v531_v40  ;;  %v494_v44 = vpop.f32.mrf.mxu2  ;;  %v640_v56 = vmul.f32 %v598_v48, %v598_v48 }
  0xad   : > { %v498_v45 = vadd.f32 %v494_v44, %v462_v39  ;;  %v616_v5 = vor.u32 1.1754944e-38, %v615_v60  ;;  %vm614_vm4 = vcmp.eq.f32.partialorder %v613_v59, 8.507059e+37 }
  0xae   : > { %v595_v46 = vadd.f32 %v591_v41, %v561_v43 }
  0xaf   : > { %v500_v47 = vand.u32 2147483647, %v498_v45 }
  0xb0   : > { %v597_v49 = vand.u32 2147483647, %v595_v46 }
  0xb1   : > { %v864_v50 = vpop.eup %863  ;;  %v603_v51 = vmax.f32 %v500_v47, 1e-12 }
  0xb2   : > { %v605_v52 = vmul.f32 %v864_v50, %v602_v37  ;;  %v599_v54 = vsub.f32 %v597_v49, %v500_v47  ;;  %v651_v58 = vmul.f32 %v597_v49, %v597_v49  ;;  %vm610_vm1 = vweird.f32 %v864_v50 }
  0xb3   : > { %865 = vrcp.f32 %v603_v51  ;;  %vm611_vm3 = vmor %vm609_vm2, %vm610_vm1  ;;  %v628_v13 = vand.u32 2147483647, %v603_v51  ;;  %v630_v14 = vand.u32 2147483648, %v603_v51  ;;  %v601_v20 = vmax.f32 %v597_v49, 1e-12 }
  0xb4   : > { %v606_v55 = vsub.f32 1.0, %v605_v52  ;;  %v641_v57 = vmul.f32 %v599_v54, %v599_v54  ;;  %v652_v63 = vadd.f32 %v651_v58, %v650_v53  ;;  %vm624_vm6 = vweird.f32 %v603_v51 }
  0xb5   : > { %v631_v23 = vor.u32 1.1754944e-38, %v630_v14  ;;  %vm629_vm8 = vcmp.eq.f32.partialorder %v628_v13, 8.507059e+37 }
  0xb6   : > { %v607_v61 = vmul.f32 %v864_v50, %v606_v55  ;;  %v642_v62 = vadd.f32 %v641_v57, %v640_v56  ;;  %v653_v2 = vrot.slane %v652_v63, 4 }
  0xb8   : > { %v608_v0 = vadd.f32 %v864_v50, %v607_v61  ;;  %v643_v1 = vrot.slane %v642_v62, 4  ;;  %v654_v10 = vadd.f32 %v653_v2, %v652_v63 }
  0xb9   : > { %v866_v3 = vpop.eup %865 }
  0xba   : > { %v612_v6 = vsel %vm611_vm3, %v864_v50, %v608_v0  ;;  %v620_v7 = vmul.f32 %v866_v3, %v603_v51  ;;  %v644_v8 = vadd.f32 %v643_v1, %v642_v62  ;;  %v655_v15 = vrot.slane %v654_v10, 2 }
  0xbb   : > { %v617_v9 = vsel %vm614_vm4, %v616_v5, %v612_v6  ;;  %vm625_vm5 = vweird.f32 %v866_v3 }
  0xbc   : > { %v621_v11 = vsub.f32 1.0, %v620_v7  ;;  %v645_v12 = vrot.slane %v644_v8, 2  ;;  %v618_v16 = vmul.f32 %v617_v9, %v600_v4  ;;  %v656_v19 = vadd.f32 %v655_v15, %v654_v10  ;;  %vm626_vm7 = vmor %vm624_vm6, %vm625_vm5 }
  0xbe   : > { %v622_v17 = vmul.f32 %v866_v3, %v621_v11  ;;  %v646_v18 = vadd.f32 %v645_v12, %v644_v8  ;;  %v657_v24 = vrot.slane %v656_v19, 1  ;;  %867 = vlog2.f32 %v618_v16 }
  0xc0   : > { %v623_v21 = vadd.f32 %v866_v3, %v622_v17  ;;  %v647_v22 = vrot.slane %v646_v18, 1  ;;  %v658_v28 = vadd.f32 %v657_v24, %v656_v19 }
  0xc2   : > { %v627_v25 = vsel %vm626_vm7, %v866_v3, %v623_v21  ;;  %v648_v26 = vadd.f32 %v647_v22, %v646_v18  ;;  %659 = vst [vmem:[%s380_s30 + $0x1] sm:$0x1] %v658_v28 }
  0xc3   : > { %v632_v27 = vsel %vm629_vm8, %v631_v23, %v627_v25 }
  0xc4   : > { %v633_v29 = vmul.f32 %v632_v27, %v601_v20  ;;  %649 = vst [vmem:[%s380_s30] sm:$0x1] %v648_v26  ;;  %v868_v30 = vpop.eup %867 }
  0xc5   : > { %v635_v31 = vmul.f32 0.6931472, %v868_v30 }
  0xc6   : > { %869 = vlog2.f32 %v633_v29 }
  0xc7   : > { %v638_v34 = vand.u32 2147483647, %v635_v31 }
  0xcc   : > { %v870_v32 = vpop.eup %869 }
  0xcd   : > { %v637_v33 = vmul.f32 0.6931472, %v870_v32 }
  0xcf   : > { %v639_v35 = vand.u32 2147483647, %v637_v33 }
  0xd1   : > { %v660_v36 = vadd.f32 %v639_v35, %v638_v34 }
  0xd3   : > { %v661_v37 = vrot.slane %v660_v36, 4 }
  0xd5   : > { %v662_v38 = vadd.f32 %v661_v37, %v660_v36 }
  0xd7   : > { %v663_v39 = vrot.slane %v662_v38, 2 }
  0xd9   : > { %v664_v40 = vadd.f32 %v663_v39, %v662_v38 }
  0xdb   : > { %v665_v41 = vrot.slane %v664_v40, 1 }
  0xdd   : > { %v666_v42 = vadd.f32 %v665_v41, %v664_v40 }
  0xdf   : > { %667 = vst [vmem:[%s380_s30 + $0x2] sm:$0x1] %v666_v42 }
  0xe0 PF: > { %s15_s20 = sadd.s32 1, %s893_s20   ;;  %s1013_s18 = smov %s889_s19 }
  0xe1   : > { %p12_p5 = scmp.ge.s32.totalorder %s15_s20, 4   ;;  %s1014_s19 = smov %s1016_s21 }
  0xe3   :  { %14 = sbr.rel (!%p12_p5) target bundleno = 2 (0x2), region = 79 }

</bundles_post_ra>
